<compile_context>
chip_gen: v7x
topology: tpu7x:2x2x1
jax: 0.10.0
libtpu: 0.0.40
codegen_flags: <defaults>
</compile_context>

<pallas_src>
import jax
import jax.numpy as jnp
from jax import lax
from jax.experimental import pallas as pl
from jax.experimental.pallas import tpu as pltpu

# MXU operand dtype (accumulation stays f32 via preferred_element_type).
MXU_DTYPE = jnp.bfloat16
LANE = 128

_VMEM_LIMIT_CACHE = None


def _vmem_limit_bytes():
    """Generation-aware scoped-VMEM budget: ~75% of physical, capped at 100 MiB.

    v5e/v6e (128 MiB physical) -> 96 MiB; v7x (64 MiB physical) -> 48 MiB.
    """
    global _VMEM_LIMIT_CACHE
    if _VMEM_LIMIT_CACHE is None:
        cap = 128 * 1024 * 1024
        try:
            cap = int(getattr(pltpu.get_tpu_info(), "vmem_capacity_bytes", cap))
        except Exception:
            pass
        _VMEM_LIMIT_CACHE = max(min((cap * 3) // 4, 100 * 1024 * 1024),
                                32 * 1024 * 1024)
    return _VMEM_LIMIT_CACHE


def _round_up(x, m):
    return ((x + m - 1) // m) * m


def _pad_cols(x, width, dtype=None):
    if x.shape[-1] != width:
        x = jnp.pad(x, ((0, 0), (0, width - x.shape[-1])))
    if dtype is not None and x.dtype != dtype:
        x = x.astype(dtype)
    return x


def _pad2d(x, rows, cols):
    return jnp.pad(x, ((0, rows - x.shape[0]), (0, cols - x.shape[1])))


def _pick_contract_tile(dpad, target=512):
    """Largest multiple of LANE dividing dpad that is <= target (din tiling)."""
    if dpad <= target:
        return dpad
    best, t = LANE, LANE
    while t <= target:
        if dpad % t == 0:
            best = t
        t += LANE
    return best


def _pick_row_tile(n, target=256):
    """Largest divisor of n that is <= target (kernel-2 output row tiling)."""
    if n <= target:
        return n
    for t in range(target, 0, -1):
        if n % t == 0:
            return t
    return n


# ---------------------------------------------------------------------------
# Kernel 1: stacked / fused Gated_Embedding_Unit.
#   grid = (modalities_in_group ["parallel"], din tiles ["arbitrary"])
#   h   = x @ W1 + b1                       (nn.Linear, accumulated over din)
#   h1  = h @ Wcg + bcg                     (Context_Gating fc)
#   h1n = BatchNorm1d(h1)                   (train-mode batch stats, eps=1e-5)
#   g   = h * sigmoid(h1n)                  (GLU of cat((h, h1n), dim=1))
#   out = g / max(||g||_2(dim=1), 1e-12)    (F.normalize), stored as bf16
# Zero-padded feature columns propagate as exact zeros through every stage.
# ---------------------------------------------------------------------------
def _geu_stack_kernel(x_ref, w1_ref, b1_ref, wcg_ref, bcg_ref, gamma_ref,
                      beta_ref, out_ref, h_acc):
    j = pl.program_id(1)

    @pl.when(j == 0)
    def _():
        h_acc[...] = jnp.zeros_like(h_acc)

    # Partial x @ W1 over the current din tile (bf16 operands, f32 accumulate).
    h_acc[...] += jnp.dot(x_ref[0].astype(MXU_DTYPE),
                          w1_ref[0].astype(MXU_DTYPE),
                          preferred_element_type=jnp.float32)

    @pl.when(j == pl.num_programs(1) - 1)
    def _():
        h = h_acc[...] + b1_ref[0]
        h1 = jnp.dot(h.astype(MXU_DTYPE), wcg_ref[0].astype(MXU_DTYPE),
                     preferred_element_type=jnp.float32) + bcg_ref[0]

        # BatchNorm1d training mode: batch stats, biased variance, eps=1e-5.
        # (Batch dim is never padded, so these statistics are exact.)
        mean = jnp.mean(h1, axis=0, keepdims=True)
        centered = h1 - mean
        var = jnp.mean(centered * centered, axis=0, keepdims=True)
        h1n = centered * lax.rsqrt(var + 1e-5) * gamma_ref[0] + beta_ref[0]

        # GLU(cat((h, h1n), 1), 1) == h * sigmoid(h1n); exact sigmoid via one
        # EUP tanh: sigmoid(x) = 0.5 * tanh(0.5 x) + 0.5.
        g = h * (0.5 * jnp.tanh(0.5 * h1n) + 0.5)

        # F.normalize: L2 along feature dim, eps=1e-12 (== rsqrt(max(ss,1e-24))).
        ss = jnp.sum(g * g, axis=1, keepdims=True)
        out_ref[0] = (g * lax.rsqrt(jnp.maximum(ss, 1e-24))).astype(out_ref.dtype)


def gated_embedding_units(x_stack, p, *, shared_x):
    """Run a group of Gated_Embedding_Units in one pallas_call.

    x_stack: (1, N, Din) bf16 if shared_x (text side) else (Kg, N, Din) bf16.
    p: dict of stacked, zero-padded parameters with leading modality dim Kg
       (w1 / wcg stored as bf16; biases / BN affine as f32).
    Returns (Kg, N, Dout) bf16 embeddings.
    """
    k_modal, din, dout = p["w1"].shape
    n = x_stack.shape[1]
    assert x_stack.shape[2] == din
    tdin = _pick_contract_tile(din)
    n_din = din // tdin

    x_map = (lambda k, j: (0, 0, j)) if shared_x else (lambda k, j: (k, 0, j))
    w1_map = lambda k, j: (k, j, 0)
    per_k = lambda k, j: (k, 0, 0)

    return pl.pallas_call(
        _geu_stack_kernel,
        out_shape=jax.ShapeDtypeStruct((k_modal, n, dout), jnp.bfloat16),
        grid_spec=pltpu.PrefetchScalarGridSpec(
            num_scalar_prefetch=0,
            grid=(k_modal, n_din),
            in_specs=[
                pl.BlockSpec((1, n, tdin), x_map),
                pl.BlockSpec((1, tdin, dout), w1_map),
                pl.BlockSpec((1, 1, dout), per_k),
                pl.BlockSpec((1, dout, dout), per_k),
                pl.BlockSpec((1, 1, dout), per_k),
                pl.BlockSpec((1, 1, dout), per_k),
                pl.BlockSpec((1, 1, dout), per_k),
            ],
            out_specs=pl.BlockSpec((1, n, dout), per_k),
            scratch_shapes=[pltpu.VMEM((n, dout), jnp.float32)],
        ),
        compiler_params=pltpu.CompilerParams(
            dimension_semantics=("parallel", "arbitrary"),
            vmem_limit_bytes=_vmem_limit_bytes()),
    )(x_stack, p["w1"], p["b1"], p["wcg"], p["bcg"], p["gamma"], p["beta"])


# ---------------------------------------------------------------------------
# Kernel 2: fused MoE gating + weighted similarity + accumulation.
#   grid = (output row tiles ["parallel"], modalities K ["arbitrary"])
#   sm    = softmax(text @ Wmoe + bmoe)                      (per row tile, k==0)
#   conf += (sm[:,k] * t_k) @ (avail[:,k] * v_k^T)           (every k, MXU)
#   conf /= sm @ avail^T                                     (last k)
# Video embeddings arrive pre-transposed (K, D, N) -> plain (TN,D)@(D,N) matmul.
# ---------------------------------------------------------------------------
def _conf_kernel(text_ref, wmoe_ref, bmoe_ref, avail_ref, availc_ref,
                 t_ref, v_ref, out_ref, sm_ref):
    k = pl.program_id(1)

    @pl.when(k == 0)
    def _():
        logits = jnp.dot(text_ref[...].astype(MXU_DTYPE),
                         wmoe_ref[...].astype(MXU_DTYPE),
                         preferred_element_type=jnp.float32) + bmoe_ref[...]
        logits = logits - jnp.max(logits, axis=1, keepdims=True)
        e = jnp.exp(logits)
        sm_ref[...] = e / jnp.sum(e, axis=1, keepdims=True)   # (TN, K)
        out_ref[...] = jnp.zeros_like(out_ref)

    # Column k of the softmax via a one-hot lane mask over the tiny K axis.
    sel = (lax.broadcasted_iota(jnp.int32, sm_ref.shape, 1) == k
           ).astype(jnp.float32)
    sm_k = jnp.sum(sm_ref[...] * sel, axis=1, keepdims=True)       # (TN, 1)
    av_k = availc_ref[0]                                           # (1, N)

    # w_k[a,b] * (t_k[a] . v_k[b]) == (sm_k * t_k)[a] . (av_k * v_k)[b]
    t_w = (sm_k * t_ref[0]).astype(MXU_DTYPE)                      # (TN, D)
    v_w = (av_k * v_ref[0]).astype(MXU_DTYPE)                      # (D, N)
    out_ref[...] += jnp.dot(t_w, v_w, preferred_element_type=jnp.float32)

    @pl.when(k == pl.num_programs(1) - 1)
    def _():
        # Normalizing denominator sum_j sm[a,j]*avail[b,j], divided out once.
        # Exact division keeps the reference's Inf/NaN behavior when no
        # modality is available for a video sample.
        denom = lax.dot_general(sm_ref[...], avail_ref[...],
                                (((1,), (1,)), ((), ())),
                                preferred_element_type=jnp.float32)
        out_ref[...] = out_ref[...] / denom


def mee_conf_matrix(text_pad, wmoe, bmoe, avail_mat, avail_cols,
                    t_stack, v_stack_t):
    k_modal, n, dmax = t_stack.shape
    assert v_stack_t.shape == (k_modal, dmax, n)
    tpad = text_pad.shape[1]
    tn = _pick_row_tile(n)

    # TODO(synk): constant-index inputs (wmoe, bmoe, avail) could use
    # pipeline_mode=pl.Buffered(1) to reclaim their second VMEM buffer on v7x.
    return pl.pallas_call(
        _conf_kernel,
        out_shape=jax.ShapeDtypeStruct((n, n), jnp.float32),
        grid_spec=pltpu.PrefetchScalarGridSpec(
            num_scalar_prefetch=0,
            grid=(n // tn, k_modal),
            in_specs=[
                pl.BlockSpec((tn, tpad), lambda i, k: (i, 0)),
                pl.BlockSpec((tpad, wmoe.shape[1]), lambda i, k: (0, 0)),
                pl.BlockSpec((1, bmoe.shape[1]), lambda i, k: (0, 0)),
                pl.BlockSpec((n, avail_mat.shape[1]), lambda i, k: (0, 0)),
                pl.BlockSpec((1, 1, n), lambda i, k: (k, 0, 0)),
                pl.BlockSpec((1, tn, dmax), lambda i, k: (k, i, 0)),
                pl.BlockSpec((1, dmax, n), lambda i, k: (k, 0, 0)),
            ],
            out_specs=pl.BlockSpec((tn, n), lambda i, k: (i, 0)),
            scratch_shapes=[pltpu.VMEM((tn, k_modal), jnp.float32)],
        ),
        compiler_params=pltpu.CompilerParams(
            dimension_semantics=("parallel", "arbitrary"),
            vmem_limit_bytes=_vmem_limit_bytes()),
    )(text_pad, wmoe, bmoe, avail_mat, avail_cols, t_stack, v_stack_t)


# ---------------------------------------------------------------------------
# Parameters: PyTorch-Linear-style uniform fan-in init, kept raw (f32) for the
# reference check, padded to 128-multiples and stacked per modality *group*
# (modalities with identical padded dims share one stacked GEU launch).
# Matmul weights are stored as bf16 (MXU operands only) to halve weight DMA.
# ---------------------------------------------------------------------------
def _geu_raw_params(key, din, dout):
    k1, k2, k3, k4 = jax.random.split(key, 4)
    s1 = 1.0 / float(din) ** 0.5
    s2 = 1.0 / float(dout) ** 0.5
    return {
        "w1": jax.random.uniform(k1, (din, dout), jnp.float32, -s1, s1),
        "b1": jax.random.uniform(k2, (1, dout), jnp.float32, -s1, s1),
        "wcg": jax.random.uniform(k3, (dout, dout), jnp.float32, -s2, s2),
        "bcg": jax.random.uniform(k4, (1, dout), jnp.float32, -s2, s2),
        "gamma": jnp.ones((1, dout), jnp.float32),    # BatchNorm1d weight
        "beta": jnp.zeros((1, dout), jnp.float32),    # BatchNorm1d bias
    }


def _pad_geu_params(raw, din_pad, dout_pad):
    return {
        "w1": _pad2d(raw["w1"], din_pad, dout_pad).astype(jnp.bfloat16),
        "b1": _pad2d(raw["b1"], 1, dout_pad),
        "wcg": _pad2d(raw["wcg"], dout_pad, dout_pad).astype(jnp.bfloat16),
        "bcg": _pad2d(raw["bcg"], 1, dout_pad),
        "gamma": _pad2d(raw["gamma"], 1, dout_pad),
        "beta": _pad2d(raw["beta"], 1, dout_pad),
    }


def _stack_params(dicts):
    return {name: jnp.stack([d[name] for d in dicts], axis=0)
            for name in dicts[0]}


def init_params(key, video_modality_dim, text_dim):
    modalities = list(video_modality_dim.keys())
    num_m = len(modalities)
    text_pad = _round_up(text_dim, LANE)
    din_pad = {m: _round_up(video_modality_dim[m][0], LANE) for m in modalities}
    dout_pad = {m: _round_up(video_modality_dim[m][1], LANE) for m in modalities}
    dout_max = max(dout_pad.values())

    keys = jax.random.split(key, 2 * num_m + 2)
    video_raw, text_raw, video_p, text_p = {}, {}, {}, {}
    for i, m in enumerate(modalities):
        din, dout = video_modality_dim[m]
        video_raw[m] = _geu_raw_params(keys[2 * i], din, dout)
        text_raw[m] = _geu_raw_params(keys[2 * i + 1], text_dim, dout)
        video_p[m] = _pad_geu_params(video_raw[m], din_pad[m], dout_pad[m])
        text_p[m] = _pad_geu_params(text_raw[m], text_pad, dout_pad[m])

    # Group modalities with identical padded dims -> one stacked launch each
    # (avoids padding every modality to the global max dimension).
    vg_map, tg_map = {}, {}
    for i, m in enumerate(modalities):
        vg_map.setdefault((din_pad[m], dout_pad[m]), []).append(i)
        tg_map.setdefault(dout_pad[m], []).append(i)

    video_groups = [
        {"idx": idxs, "din_pad": dk, "dout_pad": ok,
         "params": _stack_params([video_p[modalities[i]] for i in idxs])}
        for (dk, ok), idxs in vg_map.items()]
    text_groups = [
        {"idx": idxs, "din_pad": text_pad, "dout_pad": ok,
         "params": _stack_params([text_p[modalities[i]] for i in idxs])}
        for ok, idxs in tg_map.items()]

    sm = 1.0 / float(text_dim) ** 0.5
    wmoe = jax.random.uniform(keys[-2], (text_dim, num_m), jnp.float32, -sm, sm)
    bmoe = jax.random.uniform(keys[-1], (1, num_m), jnp.float32, -sm, sm)

    return {
        "modalities": modalities,
        "dims": {"text_pad": text_pad, "dout_max": dout_max},
        "video_groups": video_groups,
        "text_groups": text_groups,
        "wmoe_pad": _pad2d(wmoe, text_pad, num_m).astype(jnp.bfloat16),
        "bmoe": bmoe,
        "raw": {"video": video_raw, "text": text_raw,
                "wmoe": wmoe, "bmoe": bmoe},
    }


def _run_geu_groups(groups, x_for_group, shared_x, k_total, dout_max):
    collected = []
    for g in groups:
        emb = gated_embedding_units(x_for_group(g), g["params"],
                                    shared_x=shared_x)
        if g["dout_pad"] < dout_max:
            emb = jnp.pad(emb, ((0, 0), (0, 0), (0, dout_max - g["dout_pad"])))
        collected.append((g["idx"], emb))
    if len(collected) == 1 and collected[0][0] == list(range(k_total)):
        return collected[0][1]
    parts = [None] * k_total
    for idxs, emb in collected:
        for pos, i in enumerate(idxs):
            parts[i] = emb[pos]
    return jnp.stack(parts, axis=0)


# ---------------------------------------------------------------------------
# MEE forward (conf=True branch)
# ---------------------------------------------------------------------------
def mee_forward(params, text, video, ind):
    # TODO(synk): the conf=False branch of the reference broadcasts an (N, N)
    # weight against (N, D) embeddings and is only shape-valid when N == D;
    # it is not implemented.  JPoSE submodules are unused in forward.
    modalities = params["modalities"]
    k_total = len(modalities)
    dims = params["dims"]
    dout_max = dims["dout_max"]

    # bf16 activations into the kernels (they are MXU operands only).
    text_padded = _pad_cols(text, dims["text_pad"], jnp.bfloat16)   # (N, Tpad)

    v_embd = _run_geu_groups(
        params["video_groups"],
        lambda g: jnp.stack(
            [_pad_cols(video[modalities[i]], g["din_pad"], jnp.bfloat16)
             for i in g["idx"]], axis=0),
        False, k_total, dout_max)                                   # (K, N, D)

    t_embd = _run_geu_groups(
        params["text_groups"], lambda g: text_padded[None],
        True, k_total, dout_max)                                    # (K, N, D)

    # Pre-transpose the video embeddings once so kernel 2 issues a plain
    # (TN, D) @ (D, N) MXU matmul (no per-step XLU transpose of the RHS).
    v_embd_t = jnp.swapaxes(v_embd, 1, 2)                           # (K, D, N)

    # Availability indicators: (N, K) for the denominator, (K, 1, N) for the
    # cheap per-k column gate.
    avail_mat = jnp.stack([ind[m].astype(jnp.float32) for m in modalities],
                          axis=1)
    avail_cols = jnp.transpose(avail_mat)[:, None, :]

    return mee_conf_matrix(text_padded, params["wmoe_pad"], params["bmoe"],
                           avail_mat, avail_cols, t_embd, v_embd_t)


# ---------------------------------------------------------------------------
# Pure-JAX f32 reference (mirrors the PyTorch module) for a correctness check.
# ---------------------------------------------------------------------------
def _reference_forward(raw, modalities, text, video, ind):
    def geu(x, p):
        h = x @ p["w1"] + p["b1"]
        h1 = h @ p["wcg"] + p["bcg"]
        mean = jnp.mean(h1, axis=0, keepdims=True)
        var = jnp.mean((h1 - mean) ** 2, axis=0, keepdims=True)
        h1n = (h1 - mean) / jnp.sqrt(var + 1e-5) * p["gamma"] + p["beta"]
        g = h * jax.nn.sigmoid(h1n)
        nrm = jnp.maximum(jnp.sqrt(jnp.sum(g * g, axis=1, keepdims=True)), 1e-12)
        return g / nrm

    n = text.shape[0]
    sm = jax.nn.softmax(text @ raw["wmoe"] + raw["bmoe"], axis=1)      # (N, K)
    avail = jnp.stack([ind[m].astype(jnp.float32) for m in modalities], axis=1)
    w = sm[:, None, :] * avail[None, :, :]                             # (N, N, K)
    w = w / jnp.sum(w, axis=2, keepdims=True)
    conf = jnp.zeros((n, n), jnp.float32)
    for k, m in enumerate(modalities):
        t_e = geu(text, raw["text"][m])
        v_e = geu(video[m], raw["video"][m])
        conf = conf + w[:, :, k] * (t_e @ v_e.T)
    return conf


if __name__ == "__main__":
    # Small synthetic config: 2 video modalities with heterogeneous dims so the
    # per-group GEU launches and the dout re-padding path are exercised.
    video_modality_dim = {"face": (32, 32), "motion": (48, 160)}
    text_dim = 40
    batch = 8

    root = jax.random.PRNGKey(0)
    kp, kt, kv1, kv2 = jax.random.split(root, 4)

    params = init_params(kp, video_modality_dim, text_dim)

    text = jax.random.normal(kt, (batch, text_dim), jnp.float32)
    video = {
        "face": jax.random.normal(kv1, (batch, 32), jnp.float32),
        "motion": jax.random.normal(kv2, (batch, 48), jnp.float32),
    }
    # "face" always present so the MoE denominator never vanishes; "motion"
    # present for a subset of samples.
    ind = {
        "face": jnp.ones((batch,), jnp.float32),
        "motion": jnp.array([1, 0, 1, 1, 0, 1, 1, 0], jnp.float32),
    }

    conf = mee_forward(params, text, video, ind)
    jax.block_until_ready(conf)

    assert conf.shape == (batch, batch) and conf.dtype == jnp.float32
    assert bool(jnp.all(jnp.isfinite(conf)))

    conf_ref = _reference_forward(params["raw"], params["modalities"],
                                  text, video, ind)
    max_err = float(jnp.max(jnp.abs(conf - conf_ref)))
    assert bool(jnp.allclose(conf, conf_ref, rtol=5e-2, atol=5e-2)), max_err

    print("KERNEL_OK")
</pallas_src>

<mosaic_0001>
module attributes {stable_mosaic.version = 11 : i64} {
  func.func @_geu_stack_kernel(%arg0: i32, %arg1: i32, %arg2: memref<1x8x128xbf16, #tpu.memory_space<vmem>>, %arg3: memref<1x128x128xbf16, #tpu.memory_space<vmem>>, %arg4: memref<1x1x128xf32, #tpu.memory_space<vmem>>, %arg5: memref<1x128x128xbf16, #tpu.memory_space<vmem>>, %arg6: memref<1x1x128xf32, #tpu.memory_space<vmem>>, %arg7: memref<1x1x128xf32, #tpu.memory_space<vmem>>, %arg8: memref<1x1x128xf32, #tpu.memory_space<vmem>>, %arg9: memref<1x8x128xbf16, #tpu.memory_space<vmem>>, %arg10: memref<8x128xf32, #tpu.memory_space<vmem>>) attributes {dimension_semantics = [#tpu.dimension_semantics<parallel>, #tpu.dimension_semantics<arbitrary>], iteration_bounds = array<i64: 1, 1>, scalar_prefetch = 0 : i64, scratch_operands = 1 : i64, tpu.core_type = #tpu.core_type<tc>, window_params = [{transform_indices = @transform_0, window_bounds = array<i64: 1, 8, 128>}, {transform_indices = @transform_1, window_bounds = array<i64: 1, 128, 128>}, {transform_indices = @transform_2, window_bounds = array<i64: 1, 1, 128>}, {transform_indices = @transform_3, window_bounds = array<i64: 1, 128, 128>}, {transform_indices = @transform_4, window_bounds = array<i64: 1, 1, 128>}, {transform_indices = @transform_5, window_bounds = array<i64: 1, 1, 128>}, {transform_indices = @transform_6, window_bounds = array<i64: 1, 1, 128>}, {transform_indices = @transform_7, window_bounds = array<i64: 1, 8, 128>}]} {
    %c0_i32 = arith.constant 0 : i32
    %0 = arith.cmpi eq, %arg1, %c0_i32 : i32
    %1 = arith.extui %0 : i1 to i32
    %c0_i32_0 = arith.constant 0 : i32
    %2 = arith.cmpi ne, %1, %c0_i32_0 : i32
    scf.if %2 {
      %cst_12 = arith.constant 0.000000e+00 : f32
      %14 = vector.broadcast %cst_12 : f32 to vector<8x128xf32>
      %c0_13 = arith.constant 0 : index
      %c0_14 = arith.constant 0 : index
      %15 = vector.load %arg10[%c0_13, %c0_14] : memref<8x128xf32, #tpu.memory_space<vmem>>, vector<8x128xf32>
      tpu.vector_store %arg10[%c0_13, %c0_14], %14 {strides = array<i32>} : memref<8x128xf32, #tpu.memory_space<vmem>>, vector<8x128xf32>,
    } else {
    }
    %c0 = arith.constant 0 : index
    %c0_1 = arith.constant 0 : index
    %3 = vector.load %arg10[%c0, %c0_1] : memref<8x128xf32, #tpu.memory_space<vmem>>, vector<8x128xf32>
    %c0_2 = arith.constant 0 : index
    %c0_3 = arith.constant 0 : index
    %c0_4 = arith.constant 0 : index
    %4 = vector.load %arg2[%c0_2, %c0_3, %c0_4] : memref<1x8x128xbf16, #tpu.memory_space<vmem>>, vector<1x8x128xbf16>
    %5 = vector.shape_cast %4 : vector<1x8x128xbf16> to vector<8x128xbf16>
    %c0_5 = arith.constant 0 : index
    %c0_6 = arith.constant 0 : index
    %c0_7 = arith.constant 0 : index
    %6 = vector.load %arg3[%c0_5, %c0_6, %c0_7] : memref<1x128x128xbf16, #tpu.memory_space<vmem>>, vector<1x128x128xbf16>
    %7 = vector.shape_cast %6 : vector<1x128x128xbf16> to vector<128x128xbf16>
    %cst = arith.constant dense<0.000000e+00> : vector<8x128xf32>
    %8 = tpu.matmul %5, %7, %cst {dimension_numbers = #tpu.dot_dimension_numbers<[1], [0], [0], [1], [0, 0, 1, 1], [], []>} : vector<8x128xbf16>, vector<128x128xbf16>, vector<8x128xf32> -> vector<8x128xf32>
    %9 = arith.addf %3, %8 : vector<8x128xf32>
    %c0_8 = arith.constant 0 : index
    %c0_9 = arith.constant 0 : index
    %10 = vector.load %arg10[%c0_8, %c0_9] : memref<8x128xf32, #tpu.memory_space<vmem>>, vector<8x128xf32>
    tpu.vector_store %arg10[%c0_8, %c0_9], %9 {strides = array<i32>} : memref<8x128xf32, #tpu.memory_space<vmem>>, vector<8x128xf32>,
    %c0_i32_10 = arith.constant 0 : i32
    %11 = arith.cmpi eq, %arg1, %c0_i32_10 : i32
    %12 = arith.extui %11 : i1 to i32
    %c0_i32_11 = arith.constant 0 : i32
    %13 = arith.cmpi ne, %12, %c0_i32_11 : i32
    scf.if %13 {
      %c0_12 = arith.constant 0 : index
      %c0_13 = arith.constant 0 : index
      %14 = vector.load %arg10[%c0_12, %c0_13] : memref<8x128xf32, #tpu.memory_space<vmem>>, vector<8x128xf32>
      %c0_14 = arith.constant 0 : index
      %c0_15 = arith.constant 0 : index
      %c0_16 = arith.constant 0 : index
      %15 = vector.load %arg4[%c0_14, %c0_15, %c0_16] : memref<1x1x128xf32, #tpu.memory_space<vmem>>, vector<1x1x128xf32>
      %16 = vector.shape_cast %15 : vector<1x1x128xf32> to vector<1x128xf32>
      %17 = vector.broadcast %16 : vector<1x128xf32> to vector<8x128xf32>
      %18 = arith.addf %14, %17 : vector<8x128xf32>
      %19 = arith.truncf %18 : vector<8x128xf32> to vector<8x128xbf16>
      %c0_17 = arith.constant 0 : index
      %c0_18 = arith.constant 0 : index
      %c0_19 = arith.constant 0 : index
      %20 = vector.load %arg5[%c0_17, %c0_18, %c0_19] : memref<1x128x128xbf16, #tpu.memory_space<vmem>>, vector<1x128x128xbf16>
      %21 = vector.shape_cast %20 : vector<1x128x128xbf16> to vector<128x128xbf16>
      %cst_20 = arith.constant dense<0.000000e+00> : vector<8x128xf32>
      %22 = tpu.matmul %19, %21, %cst_20 {dimension_numbers = #tpu.dot_dimension_numbers<[1], [0], [0], [1], [0, 0, 1, 1], [], []>} : vector<8x128xbf16>, vector<128x128xbf16>, vector<8x128xf32> -> vector<8x128xf32>
      %c0_21 = arith.constant 0 : index
      %c0_22 = arith.constant 0 : index
      %c0_23 = arith.constant 0 : index
      %23 = vector.load %arg6[%c0_21, %c0_22, %c0_23] : memref<1x1x128xf32, #tpu.memory_space<vmem>>, vector<1x1x128xf32>
      %24 = vector.shape_cast %23 : vector<1x1x128xf32> to vector<1x128xf32>
      %25 = vector.broadcast %24 : vector<1x128xf32> to vector<8x128xf32>
      %26 = arith.addf %22, %25 : vector<8x128xf32>
      %cst_24 = arith.constant dense<0.000000e+00> : vector<128xf32>
      %27 = vector.multi_reduction <add>, %26, %cst_24 [0] : vector<8x128xf32> to vector<128xf32>
      %28 = vector.shape_cast %27 : vector<128xf32> to vector<1x128xf32>
      %cst_25 = arith.constant 8.000000e+00 : f32
      %29 = vector.broadcast %cst_25 : f32 to vector<1x128xf32>
      %30 = arith.divf %28, %29 : vector<1x128xf32>
      %31 = vector.broadcast %30 : vector<1x128xf32> to vector<8x128xf32>
      %32 = arith.subf %26, %31 : vector<8x128xf32>
      %33 = arith.mulf %32, %32 : vector<8x128xf32>
      %cst_26 = arith.constant dense<0.000000e+00> : vector<128xf32>
      %34 = vector.multi_reduction <add>, %33, %cst_26 [0] : vector<8x128xf32> to vector<128xf32>
      %35 = vector.shape_cast %34 : vector<128xf32> to vector<1x128xf32>
      %cst_27 = arith.constant 8.000000e+00 : f32
      %36 = vector.broadcast %cst_27 : f32 to vector<1x128xf32>
      %37 = arith.divf %35, %36 : vector<1x128xf32>
      %cst_28 = arith.constant 9.99999974E-6 : f32
      %38 = vector.broadcast %cst_28 : f32 to vector<1x128xf32>
      %39 = arith.addf %37, %38 : vector<1x128xf32>
      %40 = math.rsqrt %39 : vector<1x128xf32>
      %41 = vector.broadcast %40 : vector<1x128xf32> to vector<8x128xf32>
      %42 = arith.mulf %32, %41 : vector<8x128xf32>
      %c0_29 = arith.constant 0 : index
      %c0_30 = arith.constant 0 : index
      %c0_31 = arith.constant 0 : index
      %43 = vector.load %arg7[%c0_29, %c0_30, %c0_31] : memref<1x1x128xf32, #tpu.memory_space<vmem>>, vector<1x1x128xf32>
      %44 = vector.shape_cast %43 : vector<1x1x128xf32> to vector<1x128xf32>
      %45 = vector.broadcast %44 : vector<1x128xf32> to vector<8x128xf32>
      %46 = arith.mulf %42, %45 : vector<8x128xf32>
      %c0_32 = arith.constant 0 : index
      %c0_33 = arith.constant 0 : index
      %c0_34 = arith.constant 0 : index
      %47 = vector.load %arg8[%c0_32, %c0_33, %c0_34] : memref<1x1x128xf32, #tpu.memory_space<vmem>>, vector<1x1x128xf32>
      %48 = vector.shape_cast %47 : vector<1x1x128xf32> to vector<1x128xf32>
      %49 = vector.broadcast %48 : vector<1x128xf32> to vector<8x128xf32>
      %50 = arith.addf %46, %49 : vector<8x128xf32>
      %cst_35 = arith.constant 5.000000e-01 : f32
      %51 = vector.broadcast %cst_35 : f32 to vector<8x128xf32>
      %52 = arith.mulf %51, %50 : vector<8x128xf32>
      %53 = math.tanh %52 : vector<8x128xf32>
      %cst_36 = arith.constant 5.000000e-01 : f32
      %54 = vector.broadcast %cst_36 : f32 to vector<8x128xf32>
      %55 = arith.mulf %54, %53 : vector<8x128xf32>
      %cst_37 = arith.constant 5.000000e-01 : f32
      %56 = vector.broadcast %cst_37 : f32 to vector<8x128xf32>
      %57 = arith.addf %55, %56 : vector<8x128xf32>
      %58 = arith.mulf %18, %57 : vector<8x128xf32>
      %59 = arith.mulf %58, %58 : vector<8x128xf32>
      %cst_38 = arith.constant dense<0.000000e+00> : vector<8xf32>
      %60 = vector.multi_reduction <add>, %59, %cst_38 [1] : vector<8x128xf32> to vector<8xf32>
      %61 = vector.shape_cast %60 : vector<8xf32> to vector<8x1xf32>
      %cst_39 = arith.constant 1.000000e-24 : f32
      %62 = vector.broadcast %cst_39 : f32 to vector<8x1xf32>
      %63 = arith.maximumf %61, %62 : vector<8x1xf32>
      %64 = math.rsqrt %63 : vector<8x1xf32>
      %65 = vector.broadcast %64 : vector<8x1xf32> to vector<8x128xf32>
      %66 = arith.mulf %58, %65 : vector<8x128xf32>
      %67 = arith.truncf %66 : vector<8x128xf32> to vector<8x128xbf16>
      %c0_40 = arith.constant 0 : index
      %c0_41 = arith.constant 0 : index
      %c0_42 = arith.constant 0 : index
      %68 = vector.load %arg9[%c0_40, %c0_41, %c0_42] : memref<1x8x128xbf16, #tpu.memory_space<vmem>>, vector<1x8x128xbf16>
      %69 = vector.shape_cast %68 : vector<1x8x128xbf16> to vector<8x128xbf16>
      %70 = vector.shape_cast %67 : vector<8x128xbf16> to vector<1x8x128xbf16>
      tpu.vector_store %arg9[%c0_40, %c0_41, %c0_42], %70 {strides = array<i32>} : memref<1x8x128xbf16, #tpu.memory_space<vmem>>, vector<1x8x128xbf16>,
    } else {
    }
    return
  }
  func.func @transform_0(%arg0: i32, %arg1: i32) -> (i32, i32, i32) {
    %c0_i32 = arith.constant 0 : i32
    %c0_i32_0 = arith.constant 0 : i32
    return %arg0, %c0_i32, %arg1 : i32, i32, i32
  }
  func.func @transform_1(%arg0: i32, %arg1: i32) -> (i32, i32, i32) {
    %c0_i32 = arith.constant 0 : i32
    %c0_i32_0 = arith.constant 0 : i32
    return %arg0, %arg1, %c0_i32 : i32, i32, i32
  }
  func.func @transform_2(%arg0: i32, %arg1: i32) -> (i32, i32, i32) {
    %c0_i32 = arith.constant 0 : i32
    %c0_i32_0 = arith.constant 0 : i32
    %c0_i32_1 = arith.constant 0 : i32
    return %arg0, %c0_i32, %c0_i32_0 : i32, i32, i32
  }
  func.func @transform_3(%arg0: i32, %arg1: i32) -> (i32, i32, i32) {
    %c0_i32 = arith.constant 0 : i32
    %c0_i32_0 = arith.constant 0 : i32
    %c0_i32_1 = arith.constant 0 : i32
    return %arg0, %c0_i32, %c0_i32_0 : i32, i32, i32
  }
  func.func @transform_4(%arg0: i32, %arg1: i32) -> (i32, i32, i32) {
    %c0_i32 = arith.constant 0 : i32
    %c0_i32_0 = arith.constant 0 : i32
    %c0_i32_1 = arith.constant 0 : i32
    return %arg0, %c0_i32, %c0_i32_0 : i32, i32, i32
  }
  func.func @transform_5(%arg0: i32, %arg1: i32) -> (i32, i32, i32) {
    %c0_i32 = arith.constant 0 : i32
    %c0_i32_0 = arith.constant 0 : i32
    %c0_i32_1 = arith.constant 0 : i32
    return %arg0, %c0_i32, %c0_i32_0 : i32, i32, i32
  }
  func.func @transform_6(%arg0: i32, %arg1: i32) -> (i32, i32, i32) {
    %c0_i32 = arith.constant 0 : i32
    %c0_i32_0 = arith.constant 0 : i32
    %c0_i32_1 = arith.constant 0 : i32
    return %arg0, %c0_i32, %c0_i32_0 : i32, i32, i32
  }
  func.func @transform_7(%arg0: i32, %arg1: i32) -> (i32, i32, i32) {
    %c0_i32 = arith.constant 0 : i32
    %c0_i32_0 = arith.constant 0 : i32
    %c0_i32_1 = arith.constant 0 : i32
    return %arg0, %c0_i32, %c0_i32_0 : i32, i32, i32
  }
}

</mosaic_0001>

<bundles_post_ra>
// kernel: tpu_custom_call.1
= control target key start
LH: loop header
LB: loop body
LE: loop exit
PB: predicated region body
PF: predicated region fallthrough
CT: control target
= control target key end

     0   :  { %12 = vsyncpa [#allocation4], 0  ;;  %s863_s0 = inlined_call_operand.hbm [shape: bf16[1,8,128], index: 0, kind: input, shape index: {}]   ;;  %s864_s1 = inlined_call_operand.hbm [shape: bf16[1,128,128], index: 1, kind: input, shape index: {}]   ;;  %s865_s2 = inlined_call_operand.hbm [shape: f32[1,1,128], index: 2, kind: input, shape index: {}]   ;;  %s866_s3 = inlined_call_operand.hbm [shape: bf16[1,128,128], index: 3, kind: input, shape index: {}]   ;;  %s867_s4 = inlined_call_operand.hbm [shape: f32[1,1,128], index: 4, kind: input, shape index: {}]   ;;  %s868_s5 = inlined_call_operand.hbm [shape: f32[1,1,128], index: 5, kind: input, shape index: {}]   ;;  %s869_s6 = inlined_call_operand.hbm [shape: f32[1,1,128], index: 6, kind: input, shape index: {}]   ;;  %s870_s7 = inlined_call_operand.hbm [shape: bf16[1,8,128], index: 7, kind: output, shape index: {}]  }
   0x1   :  { %13 = vsyncpa [#allocation7], 0 }
   0x2   :  { %14 = vsyncpa [#allocation10], 0 }
   0x3   :  { %15 = vsyncpa [#allocation13], 0 }
   0x4   :  { %16 = vsyncpa [#allocation5], 0  ;;  %s715_s24 = smov [#allocation6]   ;;  %s529_s28 = scalar_lea.hbm %s864_s1, 1024 }
   0x5   :  { %s32_s25 = sshll.u32 %s715_s24, 4  ;;  %p530_p0 = scmp.ne.s32.totalorder %s864_s1, %s529_s28  ;;  %s33_s25 = int_to_ptr.vmem [resolvable:$true] %s32_s25 }
   0x6   :  { %p533_p1 = scmp.lt.u32.totalorder %s529_s28, %s864_s1 }
   0x8   :  { %p535_p2 = pnand %p533_p1, %p530_p0 }
   0xa   :  { %538 = shalt.err (!%p535_p2)
}
   0xb   :  { %s539_s10 = scalar_lea.vmem %s33_s25, 1024  ;;  %p544_p4 = scmp.lt.s32.totalorder %s33_s25, %s33_s25 }
   0xc   :  { %p540_p3 = scmp.ne.s32.totalorder %s33_s25, %s539_s10  ;;  %p545_p5 = scmp.lt.s32.totalorder %s539_s10, %s539_s10 }
   0xe   :  { %p546_p6 = por %p545_p5, %p544_p4 }
  0x10   :  { %p547_p7 = pnand %p546_p6, %p540_p3 }
  0x12   :  { %550 = shalt.err (!%p547_p7)
}
  0x13   :  { %s716_s11 = smov 64   ;;  %s717_s12 = smov 4  }
  0x14   :  { %38 = dma.hbm_to_vmem [thread:$0]  %s864_s1, 1024, %s33_s25, [#allocation7], %s716_s11, %s716_s11, %s717_s12  }
  0x15   :  { %s718_s15 = smov [#allocation9]   ;;  %s719_s17 = smov [#allocation12]  }
  0x16   :  { %s54_s16 = sshll.u32 %s718_s15, 4  ;;  %s77_s18 = sshll.u32 %s719_s17, 4  ;;  %s55_s16 = int_to_ptr.vmem [resolvable:$true] %s54_s16  ;;  %s78_s18 = int_to_ptr.vmem [resolvable:$true] %s77_s18 }
  0x17   :  { %s551_s21 = scalar_lea.hbm %s866_s3, 1024 }
  0x18   :  { %p552_p8 = scmp.ne.s32.totalorder %s866_s3, %s551_s21  ;;  %p555_p9 = scmp.lt.u32.totalorder %s551_s21, %s866_s3 }
  0x1a   :  { %p557_p10 = pnand %p555_p9, %p552_p8 }
  0x1c   :  { %560 = shalt.err (!%p557_p10)
}
  0x1d   :  { %s561_s1 = scalar_lea.vmem %s55_s16, 1024  ;;  %p566_p12 = scmp.lt.s32.totalorder %s55_s16, %s55_s16 }
  0x1e   :  { %p562_p11 = scmp.ne.s32.totalorder %s55_s16, %s561_s1  ;;  %p567_p13 = scmp.lt.s32.totalorder %s561_s1, %s561_s1 }
  0x20   :  { %p568_p0 = por %p567_p13, %p566_p12 }
  0x22   :  { %p569_p1 = pnand %p568_p0, %p562_p11 }
  0x24   :  { %572 = shalt.err (!%p569_p1)
}
  0x25   :  { %60 = dma.hbm_to_vmem [thread:$0]  %s866_s3, 1024, %s55_s16, [#allocation10], %s716_s11, %s716_s11, %s717_s12  }
  0x26   :  { %s573_s30 = scalar_lea.hbm %s868_s5, 16 }
  0x27   :  { %p574_p2 = scmp.ne.s32.totalorder %s868_s5, %s573_s30  ;;  %p577_p3 = scmp.lt.u32.totalorder %s573_s30, %s868_s5 }
  0x29   :  { %p579_p4 = pnand %p577_p3, %p574_p2 }
  0x2b   :  { %582 = shalt.err (!%p579_p4)
}
  0x2c   :  { %s583_s14 = scalar_lea.vmem %s78_s18, 16  ;;  %s587_s15 = scalar_lea.vmem %s78_s18, 32 }
  0x2d   :  { %p584_p5 = scmp.ne.s32.totalorder %s78_s18, %s583_s14  ;;  %p588_p6 = scmp.lt.s32.totalorder %s78_s18, %s78_s18 }
  0x2e   :  { %p589_p7 = scmp.lt.s32.totalorder %s587_s15, %s583_s14 }
  0x30   :  { %p590_p8 = por %p589_p7, %p588_p6 }
  0x32   :  { %p591_p9 = pnand %p590_p8, %p584_p5 }
  0x34   :  { %594 = shalt.err (!%p591_p9)
}
  0x35   :  { %80 = dma.hbm_to_vmem [thread:$0]  %s868_s5, 16, %s78_s18, [#allocation13]  }
  0x36   :  { %s720_s12 = smov [#allocation3]   ;;  %s721_s17 = smov [#allocation8]  }
  0x37   :  { %s23_s16 = sshll.u32 %s720_s12, 4  ;;  %s45_s19 = sshll.u32 %s721_s17, 4  ;;  %s24_s16 = int_to_ptr.vmem [resolvable:$true] %s23_s16  ;;  %s46_s19 = int_to_ptr.vmem [resolvable:$true] %s45_s19 }
  0x38   :  { %s595_s22 = scalar_lea.hbm %s863_s0, 64 }
  0x39   :  { %p596_p10 = scmp.ne.s32.totalorder %s863_s0, %s595_s22  ;;  %p599_p11 = scmp.lt.u32.totalorder %s595_s22, %s863_s0 }
  0x3b   :  { %p601_p12 = pnand %p599_p11, %p596_p10 }
  0x3d   :  { %604 = shalt.err (!%p601_p12)
}
  0x3e   :  { %s605_s5 = scalar_lea.vmem %s24_s16, 64  ;;  %p610_p0 = scmp.lt.s32.totalorder %s24_s16, %s24_s16 }
  0x3f   :  { %p606_p13 = scmp.ne.s32.totalorder %s24_s16, %s605_s5  ;;  %p611_p1 = scmp.lt.s32.totalorder %s605_s5, %s605_s5 }
  0x41   :  { %p612_p2 = por %p611_p1, %p610_p0 }
  0x43   :  { %p613_p3 = pnand %p612_p2, %p606_p13 }
  0x45   :  { %616 = shalt.err (!%p613_p3)
}
  0x46   :  { %26 = dma.hbm_to_vmem [thread:$0]  %s863_s0, 64, %s24_s16, [#allocation4]  }
  0x47   :  { %s617_s29 = scalar_lea.hbm %s865_s2, 16 }
  0x48   :  { %p618_p4 = scmp.ne.s32.totalorder %s865_s2, %s617_s29  ;;  %p621_p5 = scmp.lt.u32.totalorder %s617_s29, %s865_s2 }
  0x4a   :  { %p623_p6 = pnand %p621_p5, %p618_p4 }
  0x4c   :  { %626 = shalt.err (!%p623_p6)
}
  0x4d   :  { %s627_s13 = scalar_lea.vmem %s46_s19, 16  ;;  %s631_s14 = scalar_lea.vmem %s46_s19, 32 }
  0x4e   :  { %p628_p7 = scmp.ne.s32.totalorder %s46_s19, %s627_s13  ;;  %p632_p8 = scmp.lt.s32.totalorder %s46_s19, %s46_s19 }
  0x4f   :  { %p633_p9 = scmp.lt.s32.totalorder %s631_s14, %s627_s13 }
  0x51   :  { %p634_p10 = por %p633_p9, %p632_p8 }
  0x53   :  { %p635_p11 = pnand %p634_p10, %p628_p7 }
  0x55   :  { %638 = shalt.err (!%p635_p11)
}
  0x56   :  { %48 = dma.hbm_to_vmem [thread:$0]  %s865_s2, 16, %s46_s19, [#allocation7]  }
  0x57   :  { %s722_s3 = smov [#allocation11]   ;;  %s723_s12 = smov [#allocation14]  }
  0x58   :  { %s67_s11 = sshll.u32 %s722_s3, 4  ;;  %s87_s16 = sshll.u32 %s723_s12, 4  ;;  %s68_s11 = int_to_ptr.vmem [resolvable:$true] %s67_s11  ;;  %s88_s16 = int_to_ptr.vmem [resolvable:$true] %s87_s16 }
  0x59   :  { %s639_s21 = scalar_lea.hbm %s867_s4, 16 }
  0x5a   :  { %p640_p12 = scmp.ne.s32.totalorder %s867_s4, %s639_s21  ;;  %p643_p13 = scmp.lt.u32.totalorder %s639_s21, %s867_s4 }
  0x5c   :  { %p645_p0 = pnand %p643_p13, %p640_p12 }
  0x5e   :  { %648 = shalt.err (!%p645_p0)
}
  0x5f   :  { %s649_s2 = scalar_lea.vmem %s68_s11, 16  ;;  %s653_s19 = scalar_lea.vmem %s68_s11, 32 }
  0x60   :  { %p650_p1 = scmp.ne.s32.totalorder %s68_s11, %s649_s2  ;;  %p654_p2 = scmp.lt.s32.totalorder %s68_s11, %s68_s11 }
  0x61   :  { %p655_p3 = scmp.lt.s32.totalorder %s653_s19, %s649_s2 }
  0x63   :  { %p656_p4 = por %p655_p3, %p654_p2 }
  0x65   :  { %p657_p5 = pnand %p656_p4, %p650_p1 }
  0x67   :  { %660 = shalt.err (!%p657_p5)
}
  0x68   :  { %70 = dma.hbm_to_vmem [thread:$0]  %s867_s4, 16, %s68_s11, [#allocation10]  }
  0x69   :  { %s661_s27 = scalar_lea.hbm %s869_s6, 16 }
  0x6a   :  { %p662_p6 = scmp.ne.s32.totalorder %s869_s6, %s661_s27  ;;  %p665_p7 = scmp.lt.u32.totalorder %s661_s27, %s869_s6 }
  0x6c   :  { %p667_p8 = pnand %p665_p7, %p662_p6 }
  0x6e   :  { %670 = shalt.err (!%p667_p8)
}
  0x6f   :  { %s671_s9 = scalar_lea.vmem %s88_s16, 16  ;;  %s675_s10 = scalar_lea.vmem %s88_s16, 32 }
  0x70   :  { %p672_p9 = scmp.ne.s32.totalorder %s88_s16, %s671_s9  ;;  %p676_p10 = scmp.lt.s32.totalorder %s88_s16, %s88_s16 }
  0x71   :  { %p677_p11 = scmp.lt.s32.totalorder %s675_s10, %s671_s9 }
  0x73   :  { %p678_p12 = por %p677_p11, %p676_p10 }
  0x75   :  { %p679_p13 = pnand %p678_p12, %p672_p9 }
  0x77   :  { %682 = shalt.err (!%p679_p13)
}
  0x78   :  { %90 = dma.hbm_to_vmem [thread:$0]  %s869_s6, 16, %s88_s16, [#allocation13]  }
  0x79   :  { %705 = dma.done.wait [#allocation4], 64  }
  0x7a   :  { %706 = vsyncadd [#allocation4], 4294967232 }
  0x7b   :  { %707 = dma.done.wait [#allocation7], 1040  }
  0x7c   :  { %708 = vsyncadd [#allocation7], 4294966256 }
  0x7d   :  { %709 = dma.done.wait [#allocation10], 1040  }
  0x7e   :  { %710 = vsyncadd [#allocation10], 4294966256 }
  0x7f   :  { %711 = dma.done.wait [#allocation13], 32  }
  0x80   :  { %712 = vsyncadd [#allocation13], 4294967264  ;;  %v724_v0 = vmov 0.0   ;;  %vm725_vm0 = vmmov 0   ;;  %v507_v1 = vld [vmem:[#allocation6] sm:$0xff]   ;;  %v508_v2 = vld [vmem:[#allocation6 + $0x8] sm:$0xff]  }
  0x81   :  { %455 = vmatprep.subr.bf16.mxu0 %v724_v0  ;;  %471 = vmatprep.mubr.msk.bf16.mxu0 %vm725_vm0, %v724_v0  ;;  %v509_v3 = vld [vmem:[#allocation6 + $0x10] sm:$0xff]   ;;  %v515_v4 = vld [vmem:[#allocation9] sm:$0xff]   ;;  %v510_v5 = vld [vmem:[#allocation6 + $0x18] sm:$0xff]   ;;  %s726_s6 = smov [#allocation15]  }
  0x82   :  { %475 = vmatprep.subr.bf16.mxu1 %v724_v0  ;;  %491 = vmatprep.mubr.msk.bf16.mxu1 %vm725_vm0, %v724_v0  ;;  %v516_v6 = vld [vmem:[#allocation9 + $0x8] sm:$0xff]   ;;  %v511_v7 = vld [vmem:[#allocation6 + $0x20] sm:$0xff]   ;;  %v517_v8 = vld [vmem:[#allocation9 + $0x10] sm:$0xff]   ;;  %s405_s14 = sshll.u32 %s726_s6, 4  ;;  %s406_s14 = int_to_ptr.vmem [resolvable:$true] %s405_s14 }
  0x83   :  { %456 = vmatpush3.bf16.msra.mxu0 %v507_v1  ;;  %476 = vmatpush3.bf16.msra.mxu1 %v515_v4  ;;  %v512_v9 = vld [vmem:[#allocation6 + $0x28] sm:$0xff]   ;;  %v518_v10 = vld [vmem:[#allocation9 + $0x18] sm:$0xff]   ;;  %v513_v11 = vld [vmem:[#allocation6 + $0x30] sm:$0xff]   ;;  %s683_s0 = scalar_lea.vmem %s406_s14, 64  ;;  %p688_p1 = scmp.lt.s32.totalorder %s406_s14, %s406_s14 }
  0x84   :  { %457 = vmatprep.subr.bf16.mxu0 %v724_v0  ;;  %477 = vmatprep.subr.bf16.mxu1 %v724_v0  ;;  %v519_v12 = vld [vmem:[#allocation9 + $0x20] sm:$0xff]   ;;  %v514_v13 = vld [vmem:[#allocation6 + $0x38] sm:$0xff]   ;;  %v520_v14 = vld [vmem:[#allocation9 + $0x28] sm:$0xff]   ;;  %p684_p0 = scmp.ne.s32.totalorder %s406_s14, %s683_s0  ;;  %p689_p2 = scmp.lt.s32.totalorder %s683_s0, %s683_s0 }
  0x85   :  { %v119_v15 = vld [vmem:[#allocation3] sm:$0xf]  ;;  %v521_v16 = vld [vmem:[#allocation9 + $0x30] sm:$0xff]   ;;  %v425_v18 = vld [vmem:[#allocation8] ss:$0 sm:$0xff] }
  0x86   :  { %v522_v17 = vld [vmem:[#allocation9 + $0x38] sm:$0xff]   ;;  %v426_v25 = vld [vmem:[#allocation11] ss:$0 sm:$0xff]  ;;  %v435_v49 = vld [vmem:[#allocation12] ss:$0 sm:$0xff]  ;;  %p690_p3 = por %p689_p2, %p688_p1 }
  0x87   :  { %458 = vmatpush3.bf16.msra.mxu0 %v508_v2  ;;  %478 = vmatpush3.bf16.msra.mxu1 %v516_v6  ;;  %v436_v51 = vld [vmem:[#allocation14] ss:$0 sm:$0xff] }
  0x88   :  { %459 = vmatprep.subr.bf16.mxu0 %v724_v0  ;;  %479 = vmatprep.subr.bf16.mxu1 %v724_v0  ;;  %p691_p4 = pnand %p690_p3, %p684_p0 }
  0x8b   :  { %460 = vmatpush3.bf16.msra.mxu0 %v509_v3  ;;  %480 = vmatpush3.bf16.msra.mxu1 %v517_v8 }
  0x8c   :  { %461 = vmatprep.subr.bf16.mxu0 %v724_v0  ;;  %481 = vmatprep.subr.bf16.mxu1 %v724_v0 }
  0x8f   :  { %462 = vmatpush3.bf16.msra.mxu0 %v510_v5  ;;  %482 = vmatpush3.bf16.msra.mxu1 %v518_v10 }
  0x90   :  { %463 = vmatprep.subr.bf16.mxu0 %v724_v0  ;;  %483 = vmatprep.subr.bf16.mxu1 %v724_v0 }
  0x93   :  { %464 = vmatpush3.bf16.msra.mxu0 %v511_v7  ;;  %484 = vmatpush3.bf16.msra.mxu1 %v519_v12 }
  0x94   :  { %465 = vmatprep.subr.bf16.mxu0 %v724_v0  ;;  %485 = vmatprep.subr.bf16.mxu1 %v724_v0 }
  0x97   :  { %466 = vmatpush3.bf16.msra.mxu0 %v512_v9  ;;  %486 = vmatpush3.bf16.msra.mxu1 %v520_v14 }
  0x98   :  { %467 = vmatprep.subr.bf16.mxu0 %v724_v0  ;;  %487 = vmatprep.subr.bf16.mxu1 %v724_v0 }
  0x9b   :  { %468 = vmatpush3.bf16.msra.mxu0 %v513_v11  ;;  %488 = vmatpush3.bf16.msra.mxu1 %v521_v16 }
  0x9c   :  { %469 = vmatprep.subr.bf16.mxu0 %v724_v0  ;;  %489 = vmatprep.subr.bf16.mxu1 %v724_v0 }
  0x9f   :  { %470 = vmatpush3.bf16.msra.mxu0 %v514_v13  ;;  %490 = vmatpush3.bf16.msra.mxu1 %v522_v17 }
  0xa2   :  { %472 = vmatmul.mubr.bf16.vlgmr.msra.gmra.mrb[0].mxu0 %v119_v15 }
 0x175   :  { %v218_v19 = vpop.f32.mrb[0].mxu0 }
 0x176   :  { %v237_v20 = vadd.f32 %v425_v18, %v218_v19  ;;  %v473_v21 = vpop.f32.mrb[1].mxu0 }
 0x177   :  { %v221_v22 = vpop.f32.mrb[2].mxu0 }
 0x178   :  { %v238_v23 = vpack.c.bf16 %v237_v20, %v237_v20  ;;  %v474_v24 = vpop.f32.mrb[3].mxu0 }
 0x17a   :  { %492 = vmatmul.mubr.bf16.vlgmr.msra.gmra.mrb[0].mxu1 %v238_v23 }
 0x24d   :  { %v344_v26 = vpop.f32.mrb[0].mxu1 }
 0x24e   :  { %v345_v27 = vadd.f32 %v426_v25, %v344_v26  ;;  %v493_v28 = vpop.f32.mrb[1].mxu1 }
 0x24f   :  { %v347_v29 = vpop.f32.mrb[2].mxu1 }
 0x250   :  { %v350_v30 = vrot.slane %v345_v27, 4  ;;  %v494_v31 = vpop.f32.mrb[3].mxu1 }
 0x252   :  { %v351_v32 = vadd.f32 %v350_v30, %v345_v27 }
 0x254   :  { %v352_v33 = vrot.slane %v351_v32, 2 }
 0x256   :  { %v353_v34 = vadd.f32 %v352_v33, %v351_v32 }
 0x258   :  { %v354_v35 = vrot.slane %v353_v34, 1 }
 0x25a   :  { %v355_v36 = vadd.f32 %v354_v35, %v353_v34 }
 0x25c   :  { %v357_v37 = vmul.f32 0.125, %v355_v36 }
 0x25e   :  { %v358_v38 = vsub.f32 %v345_v27, %v357_v37 }
 0x260   :  { %v359_v39 = vmul.f32 %v358_v38, %v358_v38 }
 0x262   :  { %v360_v40 = vrot.slane %v359_v39, 4 }
 0x264   :  { %v361_v41 = vadd.f32 %v360_v40, %v359_v39 }
 0x266   :  { %v362_v42 = vrot.slane %v361_v41, 2 }
 0x268   :  { %v363_v43 = vadd.f32 %v362_v42, %v361_v41 }
 0x26a   :  { %v364_v44 = vrot.slane %v363_v43, 1 }
 0x26c   :  { %v365_v45 = vadd.f32 %v364_v44, %v363_v43 }
 0x26e   :  { %v366_v46 = vmul.f32 0.125, %v365_v45 }
 0x270   :  { %v367_v47 = vadd.f32 1e-05, %v366_v46 }
 0x272   :  { %523 = vrsqrt.f32 %v367_v47 }
 0x27c   :  { %v524_v48 = vpop.eup %523 }
 0x27d   :  { %v369_v50 = vmul.f32 %v524_v48, %v358_v38 }
 0x27f   :  { %v377_v52 = vmul.f32 %v435_v49, %v369_v50 }
 0x281   :  { %v385_v53 = vadd.f32 %v436_v51, %v377_v52 }
 0x283   :  { %v386_v54 = vmul.f32 0.5, %v385_v53 }
 0x285   :  { %525 = vtanh.f32 %v386_v54 }
 0x28f   :  { %v526_v55 = vpop.eup %525 }
 0x290   :  { %v388_v56 = vmul.f32 0.5, %v526_v55 }
 0x292   :  { %v389_v57 = vadd.f32 0.5, %v388_v56 }
 0x294   :  { %v390_v58 = vmul.f32 %v389_v57, %v237_v20 }
 0x296   :  { %v391_v59 = vmul.f32 %v390_v58, %v390_v58 }
 0x298   :  { %392 = vadd.xlane.f32.xlu0 %v391_v59 }
 0x325   :  { %v393_v60 = vpop.xlane.xlu0 %392 }
 0x326   :  { %v394_v61 = vmax.f32 %v393_v60, 1e-24 }
 0x328   :  { %527 = vrsqrt.f32 %v394_v61 }
 0x332   :  { %v528_v62 = vpop.eup %527 }
 0x333   :  { %v396_v63 = vmul.f32 %v528_v62, %v390_v58 }
 0x335   :  { %v397_v0 = vpack.c.bf16 %v396_v63, %v396_v63 }
 0x337   :  { %398 = vst [vmem:[#allocation15] sm:$0xf] %v397_v0 }
 0x338   :  { %694 = shalt.err (!%p691_p4)
}
 0x339   :  { %s695_s11 = scalar_lea.hbm %s870_s7, 64 }
 0x33a   :  { %p696_p5 = scmp.ne.s32.totalorder %s870_s7, %s695_s11  ;;  %p699_p6 = scmp.lt.u32.totalorder %s695_s11, %s870_s7 }
 0x33c   :  { %p701_p7 = pnand %p699_p6, %p696_p5 }
 0x33e   :  { %704 = shalt.err (!%p701_p7)
}
 0x33f   :  { %408 = dma.vmem_to_hbm [thread:$0]  %s406_s14, 64, %s870_s7, [#allocation5]  }
 0x340   :  { %713 = dma.done.wait [#allocation5], 64  }
 0x341   :  { %714 = vsyncadd [#allocation5], 4294967232 }
 0x342   :  { %412 = vsyncpa [#allocation4], 1 }
 0x343   :  { %413 = vsyncpa [#allocation7], 1 }
 0x344   :  { %414 = vsyncpa [#allocation10], 1 }
 0x345   :  { %415 = vsyncpa [#allocation13], 1 }
 0x346   :  { %416 = vsyncpa [#allocation5], 1 }

</bundles_post_ra>
